<compile_context>
chip_gen: v7x
topology: tpu7x:2x2x1
jax: 0.10.0
libtpu: 0.0.40
codegen_flags: <defaults>
</compile_context>

<pallas_src>
import functools

import jax
import jax.numpy as jnp
from jax.experimental import pallas as pl
from jax.experimental.pallas import tpu as pltpu

HIDDEN = 128


def _round_up(x, m):
    return ((x + m - 1) // m) * m


def dueling_kernel(s_ref, w1_ref, w2_ref, b_ref, wh_ref, q_ref, *, action_dim):
    # fc1 + tanh (bias row 0 broadcasts over the batch tile)
    h1 = jnp.tanh(
        jnp.dot(s_ref[...], w1_ref[...], preferred_element_type=jnp.float32)
        + b_ref[0:1, :]
    )
    # fc2 + tanh (bias row 1)
    h2 = jnp.tanh(
        jnp.dot(h1, w2_ref[...], preferred_element_type=jnp.float32)
        + b_ref[1:2, :]
    )
    # One lane-dense head matmul: cols [0, action_dim) = A, col action_dim = V,
    # remaining columns are zero padding.
    fused = jnp.dot(h2, wh_ref[...], preferred_element_type=jnp.float32)

    col = jax.lax.broadcasted_iota(jnp.int32, fused.shape, 1)
    v = jnp.sum(jnp.where(col == action_dim, fused, 0.0), axis=-1, keepdims=True)
    a_sum = jnp.sum(jnp.where(col < action_dim, fused, 0.0), axis=-1, keepdims=True)
    a = fused[:, :action_dim]  # lane-aligned static slice (starts at lane 0)

    # Q = V + (A - mean(A));  mean = sum / true action_dim (not padded width)
    q_ref[...] = v + (a - a_sum * (1.0 / action_dim))


def dueling_net_forward(s, w1, b1, w2, b2, wv, wa, *, block_batch=512):
    """s: [B, state_dim] f32. Weights stored [in_dim, out_dim]. Returns [B, action_dim]."""
    batch, state_dim = s.shape
    action_dim = wa.shape[1]

    # ---- pack tiny params (cuts DMA descriptors: 7 inputs -> 5) ----
    biases = jnp.concatenate([b1, b2], axis=0)                  # (2, 128)
    head_pad = max(128, _round_up(action_dim + 1, 128))         # lane-dense width
    w_head = jnp.zeros((HIDDEN, head_pad), jnp.float32)
    w_head = w_head.at[:, :action_dim].set(wa)                  # A columns
    w_head = w_head.at[:, action_dim].set(wv[:, 0])             # V column

    # ---- batch tiling: stream activations, keep weights VMEM-resident ----
    tb = min(block_batch, _round_up(batch, 8))
    b_pad = _round_up(batch, tb)
    if b_pad != batch:
        s = jnp.pad(s, ((0, b_pad - batch), (0, 0)))

    kernel = functools.partial(dueling_kernel, action_dim=action_dim)
    q_pad = pl.pallas_call(
        kernel,
        out_shape=jax.ShapeDtypeStruct((b_pad, action_dim), jnp.float32),
        grid=(b_pad // tb,),
        in_specs=[
            pl.BlockSpec((tb, state_dim), lambda i: (i, 0)),      # s: batch-tiled
            pl.BlockSpec((state_dim, HIDDEN), lambda i: (0, 0)),  # w1: resident
            pl.BlockSpec((HIDDEN, HIDDEN), lambda i: (0, 0)),     # w2: resident
            pl.BlockSpec((2, HIDDEN), lambda i: (0, 0)),          # packed biases
            pl.BlockSpec((HIDDEN, head_pad), lambda i: (0, 0)),   # fused V/A head
        ],
        out_specs=pl.BlockSpec((tb, action_dim), lambda i: (i, 0)),
        compiler_params=pltpu.CompilerParams(
            dimension_semantics=("parallel",)),  # shard batch grid across TCs (v7x)
    )(s, w1, w2, biases, w_head)
    return q_pad[:batch]


def init_params(key, state_dim, action_dim):
    """Deterministic synthetic init (PyTorch-Linear-style uniform bounds)."""
    k1, k2, k3, k4, k5, k6 = jax.random.split(key, 6)

    def u(k, shape, fan_in):
        bound = 1.0 / jnp.sqrt(jnp.float32(fan_in))
        return jax.random.uniform(k, shape, jnp.float32, -bound, bound)

    w1 = u(k1, (state_dim, HIDDEN), state_dim)   # fc1 weight (transposed vs torch)
    b1 = u(k2, (1, HIDDEN), state_dim)           # fc1 bias
    w2 = u(k3, (HIDDEN, HIDDEN), HIDDEN)         # fc2 weight (transposed vs torch)
    b2 = u(k4, (1, HIDDEN), HIDDEN)              # fc2 bias
    wv = u(k5, (HIDDEN, 1), HIDDEN)              # V head, no bias
    wa = u(k6, (HIDDEN, action_dim), HIDDEN)     # A head, no bias
    return w1, b1, w2, b2, wv, wa


def dueling_net_ref(s, w1, b1, w2, b2, wv, wa):
    """Pure-JAX reference for correctness checking."""
    h1 = jnp.tanh(s @ w1 + b1)
    h2 = jnp.tanh(h1 @ w2 + b2)
    v = h2 @ wv
    a = h2 @ wa
    return v + (a - jnp.mean(a, axis=-1, keepdims=True))


if __name__ == "__main__":
    state_dim = 16
    action_dim = 4
    batch = 8

    key = jax.random.PRNGKey(0)
    k_params, k_input = jax.random.split(key)

    params = init_params(k_params, state_dim, action_dim)
    s = jax.random.normal(k_input, (batch, state_dim), jnp.float32)

    q = dueling_net_forward(s, *params)
    q = jax.block_until_ready(q)

    q_ref = dueling_net_ref(s, *params)
    assert q.shape == (batch, action_dim)
    assert jnp.allclose(q, q_ref, atol=1e-5, rtol=1e-5), "mismatch vs reference"

    print("KERNEL_OK")
</pallas_src>

<mosaic_0001>
module attributes {stable_mosaic.version = 11 : i64} {
  func.func @dueling_kernel(%arg0: i32, %arg1: memref<8x16xf32, #tpu.memory_space<vmem>>, %arg2: memref<16x128xf32, #tpu.memory_space<vmem>>, %arg3: memref<128x128xf32, #tpu.memory_space<vmem>>, %arg4: memref<2x128xf32, #tpu.memory_space<vmem>>, %arg5: memref<128x128xf32, #tpu.memory_space<vmem>>, %arg6: memref<8x4xf32, #tpu.memory_space<vmem>>) attributes {dimension_semantics = [#tpu.dimension_semantics<parallel>], iteration_bounds = array<i64: 1>, scalar_prefetch = 0 : i64, scratch_operands = 0 : i64, tpu.core_type = #tpu.core_type<tc>, window_params = [{transform_indices = @transform_0, window_bounds = array<i64: 8, 16>}, {pipeline_mode = #tpu.pipeline_mode<synchronous>, transform_indices = @transform_1, window_bounds = array<i64: 16, 128>}, {pipeline_mode = #tpu.pipeline_mode<synchronous>, transform_indices = @transform_2, window_bounds = array<i64: 128, 128>}, {pipeline_mode = #tpu.pipeline_mode<synchronous>, transform_indices = @transform_3, window_bounds = array<i64: 2, 128>}, {pipeline_mode = #tpu.pipeline_mode<synchronous>, transform_indices = @transform_4, window_bounds = array<i64: 128, 128>}, {transform_indices = @transform_5, window_bounds = array<i64: 8, 4>}]} {
    %c0 = arith.constant 0 : index
    %c0_0 = arith.constant 0 : index
    %0 = vector.load %arg1[%c0, %c0_0] : memref<8x16xf32, #tpu.memory_space<vmem>>, vector<8x16xf32>
    %c0_1 = arith.constant 0 : index
    %c0_2 = arith.constant 0 : index
    %1 = vector.load %arg2[%c0_1, %c0_2] : memref<16x128xf32, #tpu.memory_space<vmem>>, vector<16x128xf32>
    %cst = arith.constant dense<0.000000e+00> : vector<8x128xf32>
    %2 = tpu.matmul %0, %1, %cst {dimension_numbers = #tpu.dot_dimension_numbers<[1], [0], [0], [1], [0, 0, 1, 1], [], []>} : vector<8x16xf32>, vector<16x128xf32>, vector<8x128xf32> -> vector<8x128xf32>
    %c0_3 = arith.constant 0 : index
    %c0_4 = arith.constant 0 : index
    %3 = vector.load %arg4[%c0_3, %c0_4] : memref<2x128xf32, #tpu.memory_space<vmem>>, vector<1x128xf32>
    %4 = vector.broadcast %3 : vector<1x128xf32> to vector<8x128xf32>
    %5 = arith.addf %2, %4 : vector<8x128xf32>
    %6 = math.tanh %5 : vector<8x128xf32>
    %c0_5 = arith.constant 0 : index
    %c0_6 = arith.constant 0 : index
    %7 = vector.load %arg3[%c0_5, %c0_6] : memref<128x128xf32, #tpu.memory_space<vmem>>, vector<128x128xf32>
    %cst_7 = arith.constant dense<0.000000e+00> : vector<8x128xf32>
    %8 = tpu.matmul %6, %7, %cst_7 {dimension_numbers = #tpu.dot_dimension_numbers<[1], [0], [0], [1], [0, 0, 1, 1], [], []>} : vector<8x128xf32>, vector<128x128xf32>, vector<8x128xf32> -> vector<8x128xf32>
    %c1 = arith.constant 1 : index
    %c0_8 = arith.constant 0 : index
    %9 = vector.load %arg4[%c1, %c0_8] : memref<2x128xf32, #tpu.memory_space<vmem>>, vector<1x128xf32>
    %10 = vector.broadcast %9 : vector<1x128xf32> to vector<8x128xf32>
    %11 = arith.addf %8, %10 : vector<8x128xf32>
    %12 = math.tanh %11 : vector<8x128xf32>
    %c0_9 = arith.constant 0 : index
    %c0_10 = arith.constant 0 : index
    %13 = vector.load %arg5[%c0_9, %c0_10] : memref<128x128xf32, #tpu.memory_space<vmem>>, vector<128x128xf32>
    %cst_11 = arith.constant dense<0.000000e+00> : vector<8x128xf32>
    %14 = tpu.matmul %12, %13, %cst_11 {dimension_numbers = #tpu.dot_dimension_numbers<[1], [0], [0], [1], [0, 0, 1, 1], [], []>} : vector<8x128xf32>, vector<128x128xf32>, vector<8x128xf32> -> vector<8x128xf32>
    %15 = tpu.iota {dimensions = array<i32: 1>} : vector<8x128xi32>
    %c4_i32 = arith.constant 4 : i32
    %16 = vector.broadcast %c4_i32 : i32 to vector<8x128xi32>
    %17 = arith.cmpi eq, %15, %16 : vector<8x128xi32>
    %cst_12 = arith.constant 0.000000e+00 : f32
    %18 = vector.broadcast %cst_12 : f32 to vector<8x128xf32>
    %19 = arith.select %17, %14, %18 : vector<8x128xi1>, vector<8x128xf32>
    %cst_13 = arith.constant dense<0.000000e+00> : vector<8xf32>
    %20 = vector.multi_reduction <add>, %19, %cst_13 [1] : vector<8x128xf32> to vector<8xf32>
    %21 = vector.shape_cast %20 : vector<8xf32> to vector<8x1xf32>
    %c4_i32_14 = arith.constant 4 : i32
    %22 = vector.broadcast %c4_i32_14 : i32 to vector<8x128xi32>
    %23 = arith.cmpi slt, %15, %22 : vector<8x128xi32>
    %cst_15 = arith.constant 0.000000e+00 : f32
    %24 = vector.broadcast %cst_15 : f32 to vector<8x128xf32>
    %25 = arith.select %23, %14, %24 : vector<8x128xi1>, vector<8x128xf32>
    %cst_16 = arith.constant dense<0.000000e+00> : vector<8xf32>
    %26 = vector.multi_reduction <add>, %25, %cst_16 [1] : vector<8x128xf32> to vector<8xf32>
    %27 = vector.shape_cast %26 : vector<8xf32> to vector<8x1xf32>
    %28 = vector.extract_strided_slice %14 {offsets = [0, 0], sizes = [8, 4], strides = [1, 1]} : vector<8x128xf32> to vector<8x4xf32>
    %cst_17 = arith.constant 2.500000e-01 : f32
    %29 = vector.broadcast %cst_17 : f32 to vector<8x1xf32>
    %30 = arith.mulf %27, %29 : vector<8x1xf32>
    %31 = vector.broadcast %30 : vector<8x1xf32> to vector<8x4xf32>
    %32 = arith.subf %28, %31 : vector<8x4xf32>
    %33 = vector.broadcast %21 : vector<8x1xf32> to vector<8x4xf32>
    %34 = arith.addf %33, %32 : vector<8x4xf32>
    %c0_18 = arith.constant 0 : index
    %c0_19 = arith.constant 0 : index
    %35 = vector.load %arg6[%c0_18, %c0_19] : memref<8x4xf32, #tpu.memory_space<vmem>>, vector<8x4xf32>
    tpu.vector_store %arg6[%c0_18, %c0_19], %34 {strides = array<i32>} : memref<8x4xf32, #tpu.memory_space<vmem>>, vector<8x4xf32>,
    return
  }
  func.func @transform_0(%arg0: i32) -> (i32, i32) {
    %c0_i32 = arith.constant 0 : i32
    %c0_i32_0 = arith.constant 0 : i32
    return %arg0, %c0_i32 : i32, i32
  }
  func.func @transform_1(%arg0: i32) -> (i32, i32) {
    %c0_i32 = arith.constant 0 : i32
    %c0_i32_0 = arith.constant 0 : i32
    %c0_i32_1 = arith.constant 0 : i32
    return %c0_i32, %c0_i32_0 : i32, i32
  }
  func.func @transform_2(%arg0: i32) -> (i32, i32) {
    %c0_i32 = arith.constant 0 : i32
    %c0_i32_0 = arith.constant 0 : i32
    %c0_i32_1 = arith.constant 0 : i32
    return %c0_i32, %c0_i32_0 : i32, i32
  }
  func.func @transform_3(%arg0: i32) -> (i32, i32) {
    %c0_i32 = arith.constant 0 : i32
    %c0_i32_0 = arith.constant 0 : i32
    %c0_i32_1 = arith.constant 0 : i32
    return %c0_i32, %c0_i32_0 : i32, i32
  }
  func.func @transform_4(%arg0: i32) -> (i32, i32) {
    %c0_i32 = arith.constant 0 : i32
    %c0_i32_0 = arith.constant 0 : i32
    %c0_i32_1 = arith.constant 0 : i32
    return %c0_i32, %c0_i32_0 : i32, i32
  }
  func.func @transform_5(%arg0: i32) -> (i32, i32) {
    %c0_i32 = arith.constant 0 : i32
    %c0_i32_0 = arith.constant 0 : i32
    return %arg0, %c0_i32 : i32, i32
  }
}

</mosaic_0001>

<bundles_post_ra>
// kernel: tpu_custom_call.1
= control target key start
LH: loop header
LB: loop body
LE: loop exit
PB: predicated region body
PF: predicated region fallthrough
CT: control target
= control target key end

     0   :  { %10 = vsyncpa [#allocation3], 0  ;;  %s756_s0 = inlined_call_operand.hbm [shape: f32[8,16], index: 0, kind: input, shape index: {}]   ;;  %s757_s1 = inlined_call_operand.hbm [shape: f32[16,128], index: 1, kind: input, shape index: {}]   ;;  %s758_s2 = inlined_call_operand.hbm [shape: f32[128,128], index: 2, kind: input, shape index: {}]   ;;  %s759_s3 = inlined_call_operand.vmem [shape: f32[2,128], index: 3, kind: input, shape index: {}]   ;;  %s760_s4 = inlined_call_operand.hbm [shape: f32[128,128], index: 4, kind: input, shape index: {}]   ;;  %s761_s5 = inlined_call_operand.vmem [shape: f32[8,4], index: 5, kind: output, shape index: {}]  }
   0x1   :  { %11 = vsyncpa [#allocation5], 0 }
   0x2   :  { %12 = vsyncpa [#allocation8], 0  ;;  %s631_s18 = smov [#allocation4]   ;;  %s537_s22 = scalar_lea.hbm %s757_s1, 256 }
   0x3   :  { %s28_s19 = sshll.u32 %s631_s18, 4  ;;  %p538_p0 = scmp.ne.s32.totalorder %s757_s1, %s537_s22  ;;  %s29_s19 = int_to_ptr.vmem [resolvable:$true] %s28_s19 }
   0x4   :  { %p541_p1 = scmp.lt.u32.totalorder %s537_s22, %s757_s1 }
   0x6   :  { %p543_p2 = pnand %p541_p1, %p538_p0 }
   0x8   :  { %546 = shalt.err (!%p543_p2)
}
   0x9   :  { %s547_s27 = scalar_lea.vmem %s29_s19, 256  ;;  %p552_p4 = scmp.lt.s32.totalorder %s29_s19, %s29_s19 }
   0xa   :  { %p548_p3 = scmp.ne.s32.totalorder %s29_s19, %s547_s27  ;;  %p553_p5 = scmp.lt.s32.totalorder %s547_s27, %s547_s27 }
   0xc   :  { %p554_p6 = por %p553_p5, %p552_p4 }
   0xe   :  { %p555_p7 = pnand %p554_p6, %p548_p3 }
  0x10   :  { %558 = shalt.err (!%p555_p7)
}
  0x11   :  { %s632_s28 = smov 128   ;;  %s633_s29 = smov 8  }
  0x12   :  { %34 = dma.hbm_to_vmem [thread:$0]  %s757_s1, 256, %s29_s19, [#allocation5], %s632_s28, %s632_s28, %s633_s29  }
  0x13   :  { %s634_s7 = smov [#allocation2]   ;;  %s635_s9 = smov [#allocation6]  }
  0x14   :  { %s19_s8 = sshll.u32 %s634_s7, 4  ;;  %s40_s10 = sshll.u32 %s635_s9, 4  ;;  %s20_s8 = int_to_ptr.vmem [resolvable:$true] %s19_s8  ;;  %s41_s10 = int_to_ptr.vmem [resolvable:$true] %s40_s10 }
  0x15   :  { %s559_s13 = scalar_lea.hbm %s756_s0, 128 }
  0x16   :  { %p560_p8 = scmp.ne.s32.totalorder %s756_s0, %s559_s13  ;;  %p563_p9 = scmp.lt.u32.totalorder %s559_s13, %s756_s0 }
  0x18   :  { %p565_p10 = pnand %p563_p9, %p560_p8 }
  0x1a   :  { %568 = shalt.err (!%p565_p10)
}
  0x1b   :  { %s569_s1 = scalar_lea.vmem %s20_s8, 128  ;;  %p574_p12 = scmp.lt.s32.totalorder %s20_s8, %s20_s8 }
  0x1c   :  { %p570_p11 = scmp.ne.s32.totalorder %s20_s8, %s569_s1  ;;  %p575_p13 = scmp.lt.s32.totalorder %s569_s1, %s569_s1 }
  0x1e   :  { %p576_p0 = por %p575_p13, %p574_p12 }
  0x20   :  { %p577_p1 = pnand %p576_p0, %p570_p11 }
  0x22   :  { %580 = shalt.err (!%p577_p1)
}
  0x23   :  { %22 = dma.hbm_to_vmem [thread:$0]  %s756_s0, 128, %s20_s8, [#allocation3]  }
  0x24   :  { %s581_s22 = scalar_lea.hbm %s758_s2, 2048 }
  0x25   :  { %p582_p2 = scmp.ne.s32.totalorder %s758_s2, %s581_s22  ;;  %p585_p3 = scmp.lt.u32.totalorder %s581_s22, %s758_s2 }
  0x27   :  { %p587_p4 = pnand %p585_p3, %p582_p2 }
  0x29   :  { %590 = shalt.err (!%p587_p4)
}
  0x2a   :  { %s591_s27 = scalar_lea.vmem %s41_s10, 2048  ;;  %p596_p6 = scmp.lt.s32.totalorder %s41_s10, %s41_s10 }
  0x2b   :  { %p592_p5 = scmp.ne.s32.totalorder %s41_s10, %s591_s27  ;;  %p597_p7 = scmp.lt.s32.totalorder %s591_s27, %s591_s27 }
  0x2d   :  { %p598_p8 = por %p597_p7, %p596_p6 }
  0x2f   :  { %p599_p9 = pnand %p598_p8, %p592_p5 }
  0x31   :  { %602 = shalt.err (!%p599_p9)
}
  0x32   :  { %46 = dma.hbm_to_vmem [thread:$0]  %s758_s2, 2048, %s41_s10, [#allocation5], %s632_s28, %s632_s28, %s633_s29  }
  0x33   :  { %s636_s6 = smov [#allocation7]   ;;  %s603_s11 = scalar_lea.hbm %s760_s4, 2048 }
  0x34   :  { %s54_s7 = sshll.u32 %s636_s6, 4  ;;  %p604_p10 = scmp.ne.s32.totalorder %s760_s4, %s603_s11  ;;  %s55_s7 = int_to_ptr.vmem [resolvable:$true] %s54_s7 }
  0x35   :  { %p607_p11 = scmp.lt.u32.totalorder %s603_s11, %s760_s4 }
  0x37   :  { %p609_p12 = pnand %p607_p11, %p604_p10 }
  0x39   :  { %612 = shalt.err (!%p609_p12)
}
  0x3a   :  { %s613_s16 = scalar_lea.vmem %s55_s7, 2048  ;;  %p618_p0 = scmp.lt.s32.totalorder %s55_s7, %s55_s7 }
  0x3b   :  { %p614_p13 = scmp.ne.s32.totalorder %s55_s7, %s613_s16  ;;  %p619_p1 = scmp.lt.s32.totalorder %s613_s16, %s613_s16 }
  0x3d   :  { %p620_p2 = por %p619_p1, %p618_p0 }
  0x3f   :  { %p621_p3 = pnand %p620_p2, %p614_p13 }
  0x41   :  { %624 = shalt.err (!%p621_p3)
}
  0x42   :  { %60 = dma.hbm_to_vmem [thread:$0]  %s760_s4, 2048, %s55_s7, [#allocation8], %s632_s28, %s632_s28, %s633_s29  }
  0x43   :  { %625 = dma.done.wait [#allocation3], 128  }
  0x44   :  { %626 = vsyncadd [#allocation3], 4294967168 }
  0x45   :  { %627 = dma.done.wait [#allocation5], 2304  }
  0x46   :  { %628 = vsyncadd [#allocation5], 4294964992 }
  0x47   :  { %629 = dma.done.wait [#allocation8], 2048  }
  0x48   :  { %630 = vsyncadd [#allocation8], 4294965248  ;;  %v637_v0 = vmov 0.0|0.0   ;;  %vm638_vm0 = vmmov 0   ;;  %v639_v1 = vmov 0.0   ;;  %v74_v2 = vld [vmem:[#allocation4] sm:$0xff] }
  0x49   :  { %473 = vmatprep.subr.bf16.mxu0 %v637_v0  ;;  %400 = vmatprep.mubr.msk.f32.mxu0 %vm638_vm0, %v639_v1  ;;  %v75_v3 = vld [vmem:[#allocation4 + $0x8] sm:$0xff]  ;;  %v156_v5 = vld [vmem:[#allocation6] sm:$0xff]  ;;  %v157_v6 = vld [vmem:[#allocation6 + $0x8] sm:$0xff]  ;;  %vm81_vm1 = vcmask 130048   ;;  %vm347_vm4 = vcmask 31744  }
  0x4a   :  { %476 = vmatprep.subr.bf16.mxu1 %v637_v0  ;;  %435 = vmatprep.mubr.msk.f32.mxu1 %vm638_vm0, %v639_v1  ;;  %v474_v4 = vpack.c.bf16 %v75_v3, %v74_v2  ;;  %v158_v7 = vld [vmem:[#allocation6 + $0x10] sm:$0xff]  ;;  %v477_v8 = vpack.c.bf16 %v157_v6, %v156_v5  ;;  %v159_v9 = vld [vmem:[#allocation6 + $0x18] sm:$0xff]  ;;  %v73_v10 = vld [vmem:[#allocation2] sm:$0xff] }
  0x4b   :  { %v480_v11 = vpack.c.bf16 %v159_v9, %v158_v7  ;;  %v160_v12 = vld [vmem:[#allocation6 + $0x20] sm:$0xff]  ;;  %v161_v13 = vld [vmem:[#allocation6 + $0x28] sm:$0xff]  ;;  %v162_v15 = vld [vmem:[#allocation6 + $0x30] sm:$0xff] }
  0x4c   :  { %475 = vmatpush3.bf16.msra.mxu0 %v474_v4  ;;  %478 = vmatpush3.bf16.msra.mxu1 %v477_v8  ;;  %v483_v14 = vpack.c.bf16 %v161_v13, %v160_v12  ;;  %v163_v16 = vld [vmem:[#allocation6 + $0x38] sm:$0xff]  ;;  %v164_v18 = vld [vmem:[#allocation6 + $0x40] sm:$0xff]  ;;  %v165_v19 = vld [vmem:[#allocation6 + $0x48] sm:$0xff] }
  0x4d   :  { %500 = vmatprep.subr.bf16.mxu0 %v637_v0  ;;  %479 = vmatprep.subr.bf16.mxu1 %v637_v0  ;;  %v486_v17 = vpack.c.bf16 %v163_v16, %v162_v15  ;;  %v489_v20 = vpack.c.bf16 %v165_v19, %v164_v18  ;;  %v166_v21 = vld [vmem:[#allocation6 + $0x50] sm:$0xff]  ;;  %v167_v22 = vld [vmem:[#allocation6 + $0x58] sm:$0xff]  ;;  %v168_v24 = vld [vmem:[#allocation6 + $0x60] sm:$0xff] }
  0x4e   :  { %v492_v23 = vpack.c.bf16 %v167_v22, %v166_v21  ;;  %v169_v25 = vld [vmem:[#allocation6 + $0x68] sm:$0xff]  ;;  %v170_v27 = vld [vmem:[#allocation6 + $0x70] sm:$0xff]  ;;  %v171_v28 = vld [vmem:[#allocation6 + $0x78] sm:$0xff] }
  0x4f   :  { %401 = vmatmul.mubr.msk.f32.vlgmr.msra.gmra.mrb[0].mxu0 %vm81_vm1, %v73_v10  ;;  %v495_v26 = vpack.c.bf16 %v169_v25, %v168_v24  ;;  %v498_v29 = vpack.c.bf16 %v171_v28, %v170_v27  ;;  %v248_v30 = vld [vmem:[#allocation7] sm:$0xff]  ;;  %v249_v31 = vld [vmem:[#allocation7 + $0x8] sm:$0xff]  ;;  %v250_v32 = vld [vmem:[#allocation7 + $0x10] sm:$0xff] }
  0x50   :  { %470 = vmatprep.mubr.msk.f32.mxu0 %vm638_vm0, %v639_v1  ;;  %481 = vmatpush3.bf16.msra.mxu1 %v480_v11  ;;  %v501_v33 = vpack.c.bf16 %v249_v31, %v248_v30  ;;  %v251_v34 = vld [vmem:[#allocation7 + $0x18] sm:$0xff]  ;;  %v252_v36 = vld [vmem:[#allocation7 + $0x20] sm:$0xff]  ;;  %v253_v37 = vld [vmem:[#allocation7 + $0x28] sm:$0xff]  ;;  %v334_v1 = vlaneseq }
  0x51   :  { %482 = vmatprep.subr.bf16.mxu1 %v637_v0  ;;  %v504_v35 = vpack.c.bf16 %v251_v34, %v250_v32  ;;  %v507_v38 = vpack.c.bf16 %v253_v37, %v252_v36  ;;  %v254_v39 = vld [vmem:[#allocation7 + $0x30] sm:$0xff]  ;;  %v255_v40 = vld [vmem:[#allocation7 + $0x38] sm:$0xff]  ;;  %v256_v42 = vld [vmem:[#allocation7 + $0x40] sm:$0xff] }
  0x52   :  { %502 = vmatpush3.bf16.msra.mxu0 %v501_v33  ;;  %v510_v41 = vpack.c.bf16 %v255_v40, %v254_v39  ;;  %v257_v43 = vld [vmem:[#allocation7 + $0x48] sm:$0xff]  ;;  %v258_v50 = vld [vmem:[#allocation7 + $0x50] sm:$0xff]  ;;  %v259_v51 = vld [vmem:[#allocation7 + $0x58] sm:$0xff]  ;;  %v335_v2 = vand.u32 127, %v334_v1 }
  0x53   :  { %503 = vmatprep.subr.bf16.mxu0 %v637_v0  ;;  %v513_v44 = vpack.c.bf16 %v257_v43, %v256_v42  ;;  %v356_v45 = vld [vmem:[%s759_s3] ss:$0 sm:$0xff]  ;;  %v516_v52 = vpack.c.bf16 %v259_v51, %v258_v50  ;;  %v260_v53 = vld [vmem:[#allocation7 + $0x60] sm:$0xff]  ;;  %v262_v56 = vld [vmem:[#allocation7 + $0x70] sm:$0xff] }
  0x54   :  { %484 = vmatpush3.bf16.msra.mxu1 %v483_v14  ;;  %v261_v54 = vld [vmem:[#allocation7 + $0x68] sm:$0xff]  ;;  %v263_v57 = vld [vmem:[#allocation7 + $0x78] sm:$0xff]  ;;  %vm340_vm2 = vcmp.lt.s32.totalorder %v335_v2, 4  ;;  %vm336_vm3 = vcmp.eq.s32.totalorder %v335_v2, 4 }
  0x55   :  { %485 = vmatprep.subr.bf16.mxu1 %v637_v0  ;;  %v519_v55 = vpack.c.bf16 %v261_v54, %v260_v53  ;;  %v522_v58 = vpack.c.bf16 %v263_v57, %v262_v56  ;;  %v358_v59 = vld [vmem:[%s759_s3 + $0x1] ss:$0 sm:$0xff] }
  0x56   :  { %505 = vmatpush3.bf16.msra.mxu0 %v504_v35 }
  0x57   :  { %506 = vmatprep.subr.bf16.mxu0 %v637_v0 }
  0x58   :  { %487 = vmatpush3.bf16.msra.mxu1 %v486_v17 }
  0x59   :  { %488 = vmatprep.subr.bf16.mxu1 %v637_v0 }
  0x5a   :  { %508 = vmatpush3.bf16.msra.mxu0 %v507_v38 }
  0x5b   :  { %509 = vmatprep.subr.bf16.mxu0 %v637_v0 }
  0x5c   :  { %490 = vmatpush3.bf16.msra.mxu1 %v489_v20 }
  0x5d   :  { %491 = vmatprep.subr.bf16.mxu1 %v637_v0 }
  0x5e   :  { %511 = vmatpush3.bf16.msra.mxu0 %v510_v41 }
  0x5f   :  { %512 = vmatprep.subr.bf16.mxu0 %v637_v0 }
  0x60   :  { %493 = vmatpush3.bf16.msra.mxu1 %v492_v23 }
  0x61   :  { %494 = vmatprep.subr.bf16.mxu1 %v637_v0 }
  0x62   :  { %514 = vmatpush3.bf16.msra.mxu0 %v513_v44 }
  0x63   :  { %515 = vmatprep.subr.bf16.mxu0 %v637_v0 }
  0x64   :  { %496 = vmatpush3.bf16.msra.mxu1 %v495_v26 }
  0x65   :  { %497 = vmatprep.subr.bf16.mxu1 %v637_v0 }
  0x66   :  { %517 = vmatpush3.bf16.msra.mxu0 %v516_v52 }
  0x67   :  { %518 = vmatprep.subr.bf16.mxu0 %v637_v0 }
  0x68   :  { %499 = vmatpush3.bf16.msra.mxu1 %v498_v29 }
  0x6a   :  { %520 = vmatpush3.bf16.msra.mxu0 %v519_v55 }
  0x6b   :  { %521 = vmatprep.subr.bf16.mxu0 %v637_v0 }
  0x6e   :  { %523 = vmatpush3.bf16.msra.mxu0 %v522_v58 }
 0x122   :  { %v151_v46 = vpop.f32.mrb[0].mxu0 }
 0x123   :  { %v152_v47 = vadd.f32 %v356_v45, %v151_v46  ;;  %v402_v48 = vpop.f32.mrb[1].mxu0 }
 0x125   :  { %533 = vtanh.f32 %v152_v47 }
 0x12f   :  { %v534_v49 = vpop.eup %533 }
 0x130   :  { %436 = vmatmul.mubr.f32.vlgmr.msra.gmra.mrb[0].mxu1 %v534_v49 }
 0x203   :  { %v243_v60 = vpop.f32.mrb[0].mxu1 }
 0x204   :  { %v244_v61 = vadd.f32 %v358_v59, %v243_v60  ;;  %v437_v62 = vpop.f32.mrb[1].mxu1 }
 0x206   :  { %535 = vtanh.f32 %v244_v61 }
 0x210   :  { %v536_v63 = vpop.eup %535 }
 0x211   :  { %471 = vmatmul.mubr.f32.vlgmr.msra.gmra.mrb[2].mxu0 %v536_v63 }
 0x2e4   :  { %v330_v3 = vpop.f32.mrb[2].mxu0 }
 0x2e5   :  { %v472_v4 = vpop.f32.mrb[3].mxu0  ;;  %v341_v5 = vsel %vm340_vm2, %v330_v3, 0.0  ;;  %v337_v0 = vsel %vm336_vm3, %v330_v3, 0.0 }
 0x2e6   :  { %342 = vadd.xlane.f32.xlu0 %v341_v5 }
 0x2ea   :  { %338 = vadd.xlane.f32.xlu0 %v337_v0 }
 0x373   :  { %v343_v6 = vpop.xlane.xlu0 %342 }
 0x374   :  { %v344_v7 = vmul.f32 0.25, %v343_v6 }
 0x376   :  { %v345_v8 = vsub.f32 %v330_v3, %v344_v7 }
 0x377   :  { %v339_v9 = vpop.xlane.xlu0 %338 }
 0x378   :  { %v346_v10 = vadd.f32 %v345_v8, %v339_v9 }
 0x37a   :  { %348 = vst.msk [vmem:[%s761_s5] sm:$0xff] %vm347_vm4, %v346_v10 }
 0x37b   :  { %353 = vsyncpa [#allocation3], 1 }
 0x37c   :  { %354 = vsyncpa [#allocation5], 1 }
 0x37d   :  { %355 = vsyncpa [#allocation8], 1 }

</bundles_post_ra>
